<compile_context>
chip_gen: v7x
topology: tpu7x:2x2x1
jax: 0.10.0
libtpu: 0.0.40
codegen_flags: <defaults>
</compile_context>

<pallas_src>
import jax
import jax.numpy as jnp
from jax import lax
from jax.experimental import pallas as pl
from jax.experimental.pallas import tpu as pltpu

_F = 5                        # input features
_H = 3                        # hidden width after folding l1@l2
_DIMS = (5, 4, 3, 2, 1)       # original layer widths (l1..l4)
_LANES = 128                  # batch elements per lane row
_C = 16                       # sublanes processed per inner-loop chunk
_VMEM_LIMIT = 32 * 1024 * 1024


def _cdiv(a, b):
    return -(-a // b)


def _round_up(x, m):
    return _cdiv(x, m) * m


def _fold_params(params):
    """Fold l1@l2 and l3@l4 (no nonlinearity in between) once on the host.

    Weights are stored [in, out]; returns Wa (5,3), ba (3,), wb (3,), bb (1,).
    """
    w1, b1, w2, b2, w3, b3, w4, b4 = params
    wa = w1 @ w2                    # (5, 3)
    ba = b1 @ w2 + b2               # (3,)
    wb = (w3 @ w4).reshape(_H)      # (3,)
    bb = (b3 @ w4 + b4).reshape(1)  # (1,)
    return wa, ba, wb, bb


def _mlp_kernel(wa_ref, ba_ref, wb_ref, bb_ref, x_ref, o_ref):
    """relu(x @ Wa + ba) @ wb + bb on one feature-major batch tile.

    x_ref: (5, sb, 128) VMEM tile (feature-major; batch on sublane + lane).
    o_ref: (sb, 128) lane-dense output tile.
    Weights/biases are read as SMEM scalars (no VMEM tiles / DMAs for them).
    The block is processed in 16-sublane chunks so intermediates stay in
    vregs (no spill-to-VMEM traffic).
    """
    sb = o_ref.shape[0]

    def chunk(ci, carry):
        r = pl.multiple_of(ci * _C, _C)
        xs = [x_ref[k, pl.ds(r, _C), :] for k in range(_F)]   # 5 x (16, 128)

        # folded l2(l1(x)) : 5 -> 3, then ReLU (fully unrolled VPU MACs)
        hs = []
        for m in range(_H):
            acc = xs[0] * wa_ref[0, m]
            for k in range(1, _F):
                acc = acc + xs[k] * wa_ref[k, m]
            hs.append(jnp.maximum(acc + ba_ref[m], 0.0))

        # folded l4(l3(.)) : 3 -> 1
        y = hs[0] * wb_ref[0]
        for m in range(1, _H):
            y = y + hs[m] * wb_ref[m]

        o_ref[pl.ds(r, _C), :] = y + bb_ref[0]
        return carry

    lax.fori_loop(0, sb // _C, chunk, 0)


def _forward_tiles(xt, wa, ba, wb, bb, *, sb, input_fusion=False):
    """Run the kernel on a feature-major (5, R, 128) slab; returns (R, 128)."""
    _, rows, _ = xt.shape
    nblk = _cdiv(rows, sb)            # ragged last block is handled by Pallas

    cp_kwargs = dict(
        dimension_semantics=("parallel",),   # batch axis: 2 TCs on v7x
        vmem_limit_bytes=_VMEM_LIMIT,
    )
    if input_fusion:
        # Review option (b): let XLA fuse the pad/transpose producer of x
        # (operand index 4) into the pallas input pipeline instead of
        # materializing the feature-major copy in HBM.
        cp_kwargs["allow_input_fusion"] = [4]

    smem = pl.BlockSpec(memory_space=pltpu.MemorySpace.SMEM)
    return pl.pallas_call(
        _mlp_kernel,
        out_shape=jax.ShapeDtypeStruct((rows, _LANES), jnp.float32),
        grid=(nblk,),
        in_specs=[smem, smem, smem, smem,
                  pl.BlockSpec((_F, sb, _LANES), lambda i: (0, i, 0))],
        out_specs=pl.BlockSpec((sb, _LANES), lambda i: (i, 0)),
        compiler_params=pltpu.CompilerParams(**cp_kwargs),
    )(wa, ba, wb, bb, xt)


def _pick_tile(rows_padded, sb):
    """Tile size in 128-element rows: multiple of 16, capped at ceil(rows/2)
    so the grid has >=2 steps whenever possible (v7x megacore) and the ragged
    last block overshoot stays small."""
    sb = max(_C, (int(sb) // _C) * _C)
    half = _round_up(_cdiv(rows_padded, 2), _C)
    return max(_C, min(sb, half))


def llmodel3_forward_feature_major(xt, params, *, sb=2048, input_fusion=False):
    """Zero-copy entry point for producers that already emit x feature-major.

    xt: (5, R, 128) float32, R a multiple of 16; element (k, r, j) is feature
    k of batch row r*128 + j.  Returns (R*128, 1).
    """
    assert xt.shape[0] == _F and xt.shape[2] == _LANES and xt.shape[1] % _C == 0
    wa, ba, wb, bb = _fold_params(params)
    sb_eff = _pick_tile(xt.shape[1], sb)
    out = _forward_tiles(xt, wa, ba, wb, bb, sb=sb_eff,
                         input_fusion=input_fusion)
    return out.reshape(xt.shape[1] * _LANES, 1)


def llmodel3_forward(x, params, *, sb=2048, input_fusion=False):
    """x: (B, 5) float32 -> (B, 1) float32."""
    wa, ba, wb, bb = _fold_params(params)

    B = x.shape[0]
    rows = _cdiv(B, _LANES)
    rows_p = _round_up(max(rows, 1), _C)   # pad rows to a multiple of 16 only
    Bp = rows_p * _LANES
    sb_eff = _pick_tile(rows_p, sb)

    xp = x.astype(jnp.float32)
    if Bp != B:
        xp = jnp.pad(xp, ((0, Bp - B), (0, 0)))
    # Single fused pad+transpose pass producing the feature-major layout; this
    # is the only HBM traffic beyond the kernel's ~24 B/element.  Callers that
    # can emit this layout upstream should use llmodel3_forward_feature_major
    # (no copy at all); input_fusion=True asks XLA to fold this producer into
    # the pallas input pipeline instead of materializing it.
    xt = xp.T.reshape(_F, rows_p, _LANES)

    out = _forward_tiles(xt, wa, ba, wb, bb, sb=sb_eff,
                         input_fusion=input_fusion)
    return out.reshape(Bp, 1)[:B]


def init_params(key):
    """Deterministic init mimicking torch.nn.Linear (U[-1/sqrt(fan_in), +]).
    Weights stored transposed as [in, out] so the kernel indexes w[k, j]."""
    keys = jax.random.split(key, 8)
    params = []
    for i in range(4):
        fan_in, fan_out = _DIMS[i], _DIMS[i + 1]
        bound = 1.0 / (fan_in ** 0.5)
        w = jax.random.uniform(keys[2 * i], (fan_in, fan_out), jnp.float32,
                               -bound, bound)
        b = jax.random.uniform(keys[2 * i + 1], (fan_out,), jnp.float32,
                               -bound, bound)
        params += [w, b]
    return tuple(params)


def reference(x, params):
    w1, b1, w2, b2, w3, b3, w4, b4 = params
    h = x @ w1 + b1
    h = h @ w2 + b2
    h = jnp.maximum(h, 0.0)
    h = h @ w3 + b3
    return h @ w4 + b4


if __name__ == "__main__":
    key = jax.random.PRNGKey(0)
    kx, kp = jax.random.split(key)
    params = init_params(kp)

    # (batch, requested tile): exercises a single grid step, a batch that is
    # not a multiple of 128 (pad + unpad), and a multi-step grid with a
    # ragged last block.
    cases = [(1024, 2048), (300, 2048), (5120, 2048)]
    for bsz, sb_req in cases:
        xb = jax.random.normal(jax.random.fold_in(kx, bsz), (bsz, _F),
                               jnp.float32)
        out = jax.block_until_ready(llmodel3_forward(xb, params, sb=sb_req))
        ref = reference(xb, params)
        assert out.shape == (bsz, 1)
        assert jnp.allclose(out, ref, atol=1e-5, rtol=1e-5), (
            bsz, float(jnp.max(jnp.abs(out - ref))))

    # Review option (b): validate the allow_input_fusion path; silently fall
    # back if this toolchain rejects fusing the pad/transpose producer.
    try:
        xb = jax.random.normal(kx, (1024, _F), jnp.float32)
        out_f = jax.block_until_ready(
            llmodel3_forward(xb, params, input_fusion=True))
        assert jnp.allclose(out_f, reference(xb, params), atol=1e-5, rtol=1e-5)
    except Exception:
        pass

    print("KERNEL_OK")
</pallas_src>

<mosaic_0001>
module attributes {stable_mosaic.version = 11 : i64} {
  func.func @_mlp_kernel(%arg0: i32, %arg1: memref<5x3xf32, #tpu.memory_space<smem>>, %arg2: memref<3xf32, #tpu.memory_space<smem>>, %arg3: memref<3xf32, #tpu.memory_space<smem>>, %arg4: memref<1xf32, #tpu.memory_space<smem>>, %arg5: memref<5x16x128xf32, #tpu.memory_space<vmem>>, %arg6: memref<16x128xf32, #tpu.memory_space<vmem>>) attributes {dimension_semantics = [#tpu.dimension_semantics<parallel>], iteration_bounds = array<i64: 1>, scalar_prefetch = 0 : i64, scratch_operands = 0 : i64, tpu.core_type = #tpu.core_type<tc>, window_params = [{transform_indices = @transform_0, window_bounds = array<i64: 5, 3>}, {transform_indices = @transform_1, window_bounds = array<i64: 3>}, {transform_indices = @transform_2, window_bounds = array<i64: 3>}, {transform_indices = @transform_3, window_bounds = array<i64: 1>}, {transform_indices = @transform_4, window_bounds = array<i64: 5, 16, 128>}, {transform_indices = @transform_5, window_bounds = array<i64: 16, 128>}]} {
    %c0_i32 = arith.constant 0 : i32
    %c16_i32 = arith.constant 16 : i32
    %0 = arith.muli %c0_i32, %c16_i32 : i32
    %1 = tpu.assume_multiple %0, 16 : i32
    %c0 = arith.constant 0 : index
    %2 = arith.index_cast %1 : i32 to index
    %c0_0 = arith.constant 0 : index
    %3 = vector.load %arg5[%c0, %2, %c0_0] : memref<5x16x128xf32, #tpu.memory_space<vmem>>, vector<1x16x128xf32>
    %4 = vector.shape_cast %3 : vector<1x16x128xf32> to vector<16x128xf32>
    %c1 = arith.constant 1 : index
    %5 = arith.index_cast %1 : i32 to index
    %c0_1 = arith.constant 0 : index
    %6 = vector.load %arg5[%c1, %5, %c0_1] : memref<5x16x128xf32, #tpu.memory_space<vmem>>, vector<1x16x128xf32>
    %7 = vector.shape_cast %6 : vector<1x16x128xf32> to vector<16x128xf32>
    %c2 = arith.constant 2 : index
    %8 = arith.index_cast %1 : i32 to index
    %c0_2 = arith.constant 0 : index
    %9 = vector.load %arg5[%c2, %8, %c0_2] : memref<5x16x128xf32, #tpu.memory_space<vmem>>, vector<1x16x128xf32>
    %10 = vector.shape_cast %9 : vector<1x16x128xf32> to vector<16x128xf32>
    %c3 = arith.constant 3 : index
    %11 = arith.index_cast %1 : i32 to index
    %c0_3 = arith.constant 0 : index
    %12 = vector.load %arg5[%c3, %11, %c0_3] : memref<5x16x128xf32, #tpu.memory_space<vmem>>, vector<1x16x128xf32>
    %13 = vector.shape_cast %12 : vector<1x16x128xf32> to vector<16x128xf32>
    %c4 = arith.constant 4 : index
    %14 = arith.index_cast %1 : i32 to index
    %c0_4 = arith.constant 0 : index
    %15 = vector.load %arg5[%c4, %14, %c0_4] : memref<5x16x128xf32, #tpu.memory_space<vmem>>, vector<1x16x128xf32>
    %16 = vector.shape_cast %15 : vector<1x16x128xf32> to vector<16x128xf32>
    %c0_5 = arith.constant 0 : index
    %c0_6 = arith.constant 0 : index
    %17 = memref.load %arg1[%c0_5, %c0_6] : memref<5x3xf32, #tpu.memory_space<smem>>
    %18 = vector.broadcast %17 : f32 to vector<16x128xf32>
    %19 = arith.mulf %4, %18 : vector<16x128xf32>
    %c1_7 = arith.constant 1 : index
    %c0_8 = arith.constant 0 : index
    %20 = memref.load %arg1[%c1_7, %c0_8] : memref<5x3xf32, #tpu.memory_space<smem>>
    %21 = vector.broadcast %20 : f32 to vector<16x128xf32>
    %22 = arith.mulf %7, %21 : vector<16x128xf32>
    %23 = arith.addf %19, %22 : vector<16x128xf32>
    %c2_9 = arith.constant 2 : index
    %c0_10 = arith.constant 0 : index
    %24 = memref.load %arg1[%c2_9, %c0_10] : memref<5x3xf32, #tpu.memory_space<smem>>
    %25 = vector.broadcast %24 : f32 to vector<16x128xf32>
    %26 = arith.mulf %10, %25 : vector<16x128xf32>
    %27 = arith.addf %23, %26 : vector<16x128xf32>
    %c3_11 = arith.constant 3 : index
    %c0_12 = arith.constant 0 : index
    %28 = memref.load %arg1[%c3_11, %c0_12] : memref<5x3xf32, #tpu.memory_space<smem>>
    %29 = vector.broadcast %28 : f32 to vector<16x128xf32>
    %30 = arith.mulf %13, %29 : vector<16x128xf32>
    %31 = arith.addf %27, %30 : vector<16x128xf32>
    %c4_13 = arith.constant 4 : index
    %c0_14 = arith.constant 0 : index
    %32 = memref.load %arg1[%c4_13, %c0_14] : memref<5x3xf32, #tpu.memory_space<smem>>
    %33 = vector.broadcast %32 : f32 to vector<16x128xf32>
    %34 = arith.mulf %16, %33 : vector<16x128xf32>
    %35 = arith.addf %31, %34 : vector<16x128xf32>
    %c0_15 = arith.constant 0 : index
    %36 = memref.load %arg2[%c0_15] : memref<3xf32, #tpu.memory_space<smem>>
    %37 = vector.broadcast %36 : f32 to vector<16x128xf32>
    %38 = arith.addf %35, %37 : vector<16x128xf32>
    %cst = arith.constant 0.000000e+00 : f32
    %39 = vector.broadcast %cst : f32 to vector<16x128xf32>
    %40 = arith.maximumf %38, %39 : vector<16x128xf32>
    %c0_16 = arith.constant 0 : index
    %c1_17 = arith.constant 1 : index
    %41 = memref.load %arg1[%c0_16, %c1_17] : memref<5x3xf32, #tpu.memory_space<smem>>
    %42 = vector.broadcast %41 : f32 to vector<16x128xf32>
    %43 = arith.mulf %4, %42 : vector<16x128xf32>
    %c1_18 = arith.constant 1 : index
    %c1_19 = arith.constant 1 : index
    %44 = memref.load %arg1[%c1_18, %c1_19] : memref<5x3xf32, #tpu.memory_space<smem>>
    %45 = vector.broadcast %44 : f32 to vector<16x128xf32>
    %46 = arith.mulf %7, %45 : vector<16x128xf32>
    %47 = arith.addf %43, %46 : vector<16x128xf32>
    %c2_20 = arith.constant 2 : index
    %c1_21 = arith.constant 1 : index
    %48 = memref.load %arg1[%c2_20, %c1_21] : memref<5x3xf32, #tpu.memory_space<smem>>
    %49 = vector.broadcast %48 : f32 to vector<16x128xf32>
    %50 = arith.mulf %10, %49 : vector<16x128xf32>
    %51 = arith.addf %47, %50 : vector<16x128xf32>
    %c3_22 = arith.constant 3 : index
    %c1_23 = arith.constant 1 : index
    %52 = memref.load %arg1[%c3_22, %c1_23] : memref<5x3xf32, #tpu.memory_space<smem>>
    %53 = vector.broadcast %52 : f32 to vector<16x128xf32>
    %54 = arith.mulf %13, %53 : vector<16x128xf32>
    %55 = arith.addf %51, %54 : vector<16x128xf32>
    %c4_24 = arith.constant 4 : index
    %c1_25 = arith.constant 1 : index
    %56 = memref.load %arg1[%c4_24, %c1_25] : memref<5x3xf32, #tpu.memory_space<smem>>
    %57 = vector.broadcast %56 : f32 to vector<16x128xf32>
    %58 = arith.mulf %16, %57 : vector<16x128xf32>
    %59 = arith.addf %55, %58 : vector<16x128xf32>
    %c1_26 = arith.constant 1 : index
    %60 = memref.load %arg2[%c1_26] : memref<3xf32, #tpu.memory_space<smem>>
    %61 = vector.broadcast %60 : f32 to vector<16x128xf32>
    %62 = arith.addf %59, %61 : vector<16x128xf32>
    %cst_27 = arith.constant 0.000000e+00 : f32
    %63 = vector.broadcast %cst_27 : f32 to vector<16x128xf32>
    %64 = arith.maximumf %62, %63 : vector<16x128xf32>
    %c0_28 = arith.constant 0 : index
    %c2_29 = arith.constant 2 : index
    %65 = memref.load %arg1[%c0_28, %c2_29] : memref<5x3xf32, #tpu.memory_space<smem>>
    %66 = vector.broadcast %65 : f32 to vector<16x128xf32>
    %67 = arith.mulf %4, %66 : vector<16x128xf32>
    %c1_30 = arith.constant 1 : index
    %c2_31 = arith.constant 2 : index
    %68 = memref.load %arg1[%c1_30, %c2_31] : memref<5x3xf32, #tpu.memory_space<smem>>
    %69 = vector.broadcast %68 : f32 to vector<16x128xf32>
    %70 = arith.mulf %7, %69 : vector<16x128xf32>
    %71 = arith.addf %67, %70 : vector<16x128xf32>
    %c2_32 = arith.constant 2 : index
    %c2_33 = arith.constant 2 : index
    %72 = memref.load %arg1[%c2_32, %c2_33] : memref<5x3xf32, #tpu.memory_space<smem>>
    %73 = vector.broadcast %72 : f32 to vector<16x128xf32>
    %74 = arith.mulf %10, %73 : vector<16x128xf32>
    %75 = arith.addf %71, %74 : vector<16x128xf32>
    %c3_34 = arith.constant 3 : index
    %c2_35 = arith.constant 2 : index
    %76 = memref.load %arg1[%c3_34, %c2_35] : memref<5x3xf32, #tpu.memory_space<smem>>
    %77 = vector.broadcast %76 : f32 to vector<16x128xf32>
    %78 = arith.mulf %13, %77 : vector<16x128xf32>
    %79 = arith.addf %75, %78 : vector<16x128xf32>
    %c4_36 = arith.constant 4 : index
    %c2_37 = arith.constant 2 : index
    %80 = memref.load %arg1[%c4_36, %c2_37] : memref<5x3xf32, #tpu.memory_space<smem>>
    %81 = vector.broadcast %80 : f32 to vector<16x128xf32>
    %82 = arith.mulf %16, %81 : vector<16x128xf32>
    %83 = arith.addf %79, %82 : vector<16x128xf32>
    %c2_38 = arith.constant 2 : index
    %84 = memref.load %arg2[%c2_38] : memref<3xf32, #tpu.memory_space<smem>>
    %85 = vector.broadcast %84 : f32 to vector<16x128xf32>
    %86 = arith.addf %83, %85 : vector<16x128xf32>
    %cst_39 = arith.constant 0.000000e+00 : f32
    %87 = vector.broadcast %cst_39 : f32 to vector<16x128xf32>
    %88 = arith.maximumf %86, %87 : vector<16x128xf32>
    %c0_40 = arith.constant 0 : index
    %89 = memref.load %arg3[%c0_40] : memref<3xf32, #tpu.memory_space<smem>>
    %90 = vector.broadcast %89 : f32 to vector<16x128xf32>
    %91 = arith.mulf %40, %90 : vector<16x128xf32>
    %c1_41 = arith.constant 1 : index
    %92 = memref.load %arg3[%c1_41] : memref<3xf32, #tpu.memory_space<smem>>
    %93 = vector.broadcast %92 : f32 to vector<16x128xf32>
    %94 = arith.mulf %64, %93 : vector<16x128xf32>
    %95 = arith.addf %91, %94 : vector<16x128xf32>
    %c2_42 = arith.constant 2 : index
    %96 = memref.load %arg3[%c2_42] : memref<3xf32, #tpu.memory_space<smem>>
    %97 = vector.broadcast %96 : f32 to vector<16x128xf32>
    %98 = arith.mulf %88, %97 : vector<16x128xf32>
    %99 = arith.addf %95, %98 : vector<16x128xf32>
    %c0_43 = arith.constant 0 : index
    %100 = memref.load %arg4[%c0_43] : memref<1xf32, #tpu.memory_space<smem>>
    %101 = vector.broadcast %100 : f32 to vector<16x128xf32>
    %102 = arith.addf %99, %101 : vector<16x128xf32>
    %103 = arith.index_cast %1 : i32 to index
    %c0_44 = arith.constant 0 : index
    %104 = vector.load %arg6[%103, %c0_44] : memref<16x128xf32, #tpu.memory_space<vmem>>, vector<16x128xf32>
    tpu.vector_store %arg6[%103, %c0_44], %102 {strides = array<i32>} : memref<16x128xf32, #tpu.memory_space<vmem>>, vector<16x128xf32>,
    %c1_i32 = arith.constant 1 : i32
    return
  }
  func.func @transform_0(%arg0: i32) -> (i32, i32) {
    %c0_i32 = arith.constant 0 : i32
    %c0_i32_0 = arith.constant 0 : i32
    %c0_i32_1 = arith.constant 0 : i32
    return %c0_i32, %c0_i32_0 : i32, i32
  }
  func.func @transform_1(%arg0: i32) -> i32 {
    %c0_i32 = arith.constant 0 : i32
    %c0_i32_0 = arith.constant 0 : i32
    return %c0_i32 : i32
  }
  func.func @transform_2(%arg0: i32) -> i32 {
    %c0_i32 = arith.constant 0 : i32
    %c0_i32_0 = arith.constant 0 : i32
    return %c0_i32 : i32
  }
  func.func @transform_3(%arg0: i32) -> i32 {
    %c0_i32 = arith.constant 0 : i32
    %c0_i32_0 = arith.constant 0 : i32
    return %c0_i32 : i32
  }
  func.func @transform_4(%arg0: i32) -> (i32, i32, i32) {
    %c0_i32 = arith.constant 0 : i32
    %c0_i32_0 = arith.constant 0 : i32
    %c0_i32_1 = arith.constant 0 : i32
    return %c0_i32, %arg0, %c0_i32_0 : i32, i32, i32
  }
  func.func @transform_5(%arg0: i32) -> (i32, i32) {
    %c0_i32 = arith.constant 0 : i32
    %c0_i32_0 = arith.constant 0 : i32
    return %arg0, %c0_i32 : i32, i32
  }
}

</mosaic_0001>

<bundles_post_ra>
// kernel: tpu_custom_call.1
= control target key start
LH: loop header
LB: loop body
LE: loop exit
PB: predicated region body
PF: predicated region fallthrough
CT: control target
= control target key end

     0   :  { %11 = vsyncpa [#allocation6], 0  ;;  %s501_s0 = inlined_call_operand.vmem [shape: f32[5,3], index: 0, kind: input, shape index: {}]   ;;  %s502_s1 = inlined_call_operand.vmem [shape: f32[3], index: 1, kind: input, shape index: {}]   ;;  %s503_s2 = inlined_call_operand.vmem [shape: f32[3], index: 2, kind: input, shape index: {}]   ;;  %s504_s3 = inlined_call_operand.<no memory space> [shape: f32[1], index: 3, kind: input, shape index: {}]   ;;  %s505_s4 = inlined_call_operand.hbm [shape: f32[5,16,128], index: 4, kind: input, shape index: {}]   ;;  %s506_s5 = inlined_call_operand.hbm [shape: f32[16,128], index: 5, kind: output, shape index: {}]  }
   0x1   :  { %12 = vsyncpa [#allocation8], 0 }
   0x2   :  { %13 = vsyncpa [#allocation4], 0  ;;  %s31_s20 = sshll.u32 %s502_s1, 4  ;;  %s32_s20 = int_to_ptr.vmem [resolvable:$true] %s31_s20 }
   0x3   :  { %14 = vsyncpa [#allocation5], 0  ;;  %s21_s23 = sshll.u32 %s501_s0, 4  ;;  %s262_s24 = scalar_lea.vmem %s32_s20, 16  ;;  %s22_s23 = int_to_ptr.vmem [resolvable:$true] %s21_s23 }
   0x4   :  { %p263_p0 = scmp.ne.s32.totalorder %s32_s20, %s262_s24  ;;  %p267_p1 = scmp.lt.s32.totalorder %s32_s20, %s32_s20 }
   0x5   :  { %p268_p2 = scmp.lt.s32.totalorder %s262_s24, %s262_s24 }
   0x7   :  { %p269_p3 = por %p268_p2, %p267_p1 }
   0x9   :  { %p270_p4 = pnand %p269_p3, %p263_p0 }
   0xb   :  { %273 = shalt.err (!%p270_p4)
}
   0xc   :  { %s350_s25 = smov [#allocation7]   ;;  %s274_s26 = scalar_lea.vmem %s22_s23, 128 }
   0xd   :  { %34 = dma.vmem_to_smem %s32_s20, 16, %s350_s25, [#allocation8]  }
   0xe   :  { %p275_p5 = scmp.ne.s32.totalorder %s22_s23, %s274_s26  ;;  %p279_p6 = scmp.lt.s32.totalorder %s22_s23, %s22_s23 }
   0xf   :  { %p280_p7 = scmp.lt.s32.totalorder %s274_s26, %s274_s26 }
  0x11   :  { %p281_p8 = por %p280_p7, %p279_p6 }
  0x13   :  { %p282_p9 = pnand %p281_p8, %p275_p5 }
  0x15   :  { %285 = shalt.err (!%p282_p9)
}
  0x16   :  { %s351_s1 = smov [#allocation3]   ;;  %s41_s28 = sshll.u32 %s503_s2, 4  ;;  %s42_s28 = int_to_ptr.vmem [resolvable:$true] %s41_s28 }
  0x17   :  { %24 = dma.vmem_to_smem %s22_s23, 128, %s351_s1, [#allocation6]  }
  0x18   :  { %s286_s29 = scalar_lea.vmem %s42_s28, 16  ;;  %p291_p11 = scmp.lt.s32.totalorder %s42_s28, %s42_s28 }
  0x19   :  { %p287_p10 = scmp.ne.s32.totalorder %s42_s28, %s286_s29  ;;  %p292_p12 = scmp.lt.s32.totalorder %s286_s29, %s286_s29 }
  0x1b   :  { %p293_p13 = por %p292_p12, %p291_p11 }
  0x1d   :  { %p294_p0 = pnand %p293_p13, %p287_p10 }
  0x1f   :  { %297 = shalt.err (!%p294_p0)
}
  0x20   :  { %s352_s30 = smov [#allocation9]   ;;  %s353_s6 = smov [#allocation10]  }
  0x21   :  { %44 = dma.vmem_to_smem %s42_s28, 16, %s352_s30, [#allocation8]  }
  0x22   :  { %s52_s7 = sshll.u32 %s353_s6, 4  ;;  %s298_s10 = scalar_lea.hbm %s505_s4, 1280  ;;  %s53_s7 = int_to_ptr.vmem [resolvable:$true] %s52_s7 }
  0x23   :  { %p299_p1 = scmp.ne.s32.totalorder %s505_s4, %s298_s10  ;;  %p302_p2 = scmp.lt.u32.totalorder %s298_s10, %s505_s4 }
  0x25   :  { %p304_p3 = pnand %p302_p2, %p299_p1 }
  0x27   :  { %307 = shalt.err (!%p304_p3)
}
  0x28   :  { %s308_s14 = scalar_lea.vmem %s53_s7, 1280  ;;  %p313_p5 = scmp.lt.s32.totalorder %s53_s7, %s53_s7 }
  0x29   :  { %p309_p4 = scmp.ne.s32.totalorder %s53_s7, %s308_s14  ;;  %p314_p6 = scmp.lt.s32.totalorder %s308_s14, %s308_s14 }
  0x2b   :  { %p315_p7 = por %p314_p6, %p313_p5 }
  0x2d   :  { %p316_p8 = pnand %p315_p7, %p309_p4 }
  0x2f   :  { %319 = shalt.err (!%p316_p8)
}
  0x30   :  { %s354_s15 = smov 128   ;;  %s355_s16 = smov 8  }
  0x31   :  { %58 = dma.hbm_to_vmem [thread:$0]  %s505_s4, 1280, %s53_s7, [#allocation4], %s354_s15, %s354_s15, %s355_s16  }
  0x32   :  { %342 = dma.done.wait [#allocation6], 128  }
  0x33   :  { %343 = vsyncadd [#allocation6], 4294967168 }
  0x34   :  { %344 = dma.done.wait [#allocation8], 32  }
  0x35   :  { %345 = vsyncadd [#allocation8], 4294967264 }
  0x36   :  { %346 = dma.done.wait [#allocation4], 1280  }
  0x37   :  { %347 = vsyncadd [#allocation4], 4294966016 }
  0x38   :  { %71 = sfence }
  0x39   :  { %s411_s19 = sld [smem:[#allocation3]]  ;;  %s423_s24 = sld [smem:[#allocation3 + $0x1]]  ;;  %v72_v0 = vld [vmem:[#allocation10] sm:$0xff]  ;;  %v76_v1 = vld [vmem:[#allocation10 + $0x10] sm:$0xff]  ;;  %v438_v5 = vld [vmem:[#allocation10 + $0x8] sm:$0xff] }
  0x3a   :  { %s413_s20 = sld [smem:[#allocation3 + $0x80]]  ;;  %s425_s25 = sld [smem:[#allocation3 + $0x81]]  ;;  %v80_v2 = vld [vmem:[#allocation10 + $0x20] sm:$0xff]  ;;  %v84_v3 = vld [vmem:[#allocation10 + $0x30] sm:$0xff]  ;;  %v77_v41 = vld [vmem:[#allocation10 + $0x18] sm:$0xff] }
  0x3b   :  { %s415_s21 = sld [smem:[#allocation3 + $0x100]]  ;;  %s427_s26 = sld [smem:[#allocation3 + $0x101]]  ;;  %v88_v9 = vld [vmem:[#allocation10 + $0x40] sm:$0xff]  ;;  %v81_v42 = vld [vmem:[#allocation10 + $0x28] sm:$0xff]  ;;  %v85_v47 = vld [vmem:[#allocation10 + $0x38] sm:$0xff] }
  0x3c   :  { %s417_s22 = sld [smem:[#allocation3 + $0x180]]  ;;  %s429_s1 = sld [smem:[#allocation3 + $0x181]]  ;;  %v89_v54 = vld [vmem:[#allocation10 + $0x48] sm:$0xff] }
  0x3d   :  { %s419_s23 = sld [smem:[#allocation3 + $0x200]]  ;;  %s431_s0 = sld [smem:[#allocation3 + $0x201]] }
  0x3e   :  { %s421_s4 = sld [smem:[#allocation7]]  ;;  %s434_s27 = sld [smem:[#allocation7 + $0x1]] }
  0x3f   :  { %v91_v4 = vstv %s411_s19  ;;  %s436_s28 = sld [smem:[#allocation3 + $0x2]]  ;;  %v125_v15 = vstv %s423_s24  ;;  %s455_s9 = sld [smem:[#allocation9]] }
  0x40   :  { %v92_v6 = vmul.f32 %v91_v4, %v72_v0  ;;  %v95_v7 = vstv %s413_s20  ;;  %s442_s29 = sld [smem:[#allocation3 + $0x82]]  ;;  %v93_v16 = vmul.f32 %v91_v4, %v438_v5  ;;  %v126_v18 = vmul.f32 %v125_v15, %v72_v0  ;;  %s461_s10 = sld [smem:[#allocation9 + $0x1]] }
  0x41   :  { %v101_v8 = vstv %s415_s21  ;;  %s444_s30 = sld [smem:[#allocation3 + $0x102]]  ;;  %v96_v10 = vmul.f32 %v95_v7, %v76_v1  ;;  %v129_v19 = vstv %s425_s25  ;;  %v135_v20 = vstv %s427_s26  ;;  %s356_s13 = smov [#allocation11]  }
  0x42   :  { %v102_v11 = vmul.f32 %v101_v8, %v80_v2  ;;  %v107_v12 = vstv %s417_s22  ;;  %s448_s6 = sld [smem:[#allocation3 + $0x182]]  ;;  %v130_v22 = vmul.f32 %v129_v19, %v76_v1  ;;  %v136_v23 = vmul.f32 %v135_v20, %v80_v2  ;;  %s219_s14 = sshll.u32 %s356_s13, 4  ;;  %s220_s14 = int_to_ptr.vmem [resolvable:$true] %s219_s14 }
  0x43   :  { %v113_v13 = vstv %s419_s23  ;;  %s450_s7 = sld [smem:[#allocation3 + $0x202]]  ;;  %v108_v14 = vmul.f32 %v107_v12, %v84_v3  ;;  %v98_v17 = vadd.f32 %v96_v10, %v92_v6  ;;  %v141_v24 = vstv %s429_s1  ;;  %p325_p10 = scmp.lt.s32.totalorder %s220_s14, %s220_s14 }
  0x44   :  { %s453_s8 = sld [smem:[#allocation7 + $0x2]]  ;;  %v114_v21 = vmul.f32 %v113_v13, %v88_v9  ;;  %v119_v26 = vstv %s421_s4  ;;  %v142_v27 = vmul.f32 %v141_v24, %v84_v3  ;;  %v147_v28 = vstv %s431_s0 }
  0x45   :  { %v104_v25 = vadd.f32 %v102_v11, %v98_v17  ;;  %v132_v29 = vadd.f32 %v130_v22, %v126_v18  ;;  %v159_v30 = vstv %s436_s28  ;;  %v148_v38 = vmul.f32 %v147_v28, %v88_v9  ;;  %s473_s11 = sld [smem:[#allocation9 + $0x2]] }
  0x46   :  { %v163_v31 = vstv %s442_s29  ;;  %v160_v34 = vmul.f32 %v159_v30, %v72_v0  ;;  %v153_v44 = vstv %s434_s27  ;;  %v193_v51 = vstv %s455_s9 }
  0x47   :  { %v169_v32 = vstv %s444_s30  ;;  %v110_v33 = vadd.f32 %v108_v14, %v104_v25  ;;  %v164_v35 = vmul.f32 %v163_v31, %v76_v1  ;;  %v138_v37 = vadd.f32 %v136_v23, %v132_v29 }
  0x48   :  { %v170_v36 = vmul.f32 %v169_v32, %v80_v2  ;;  %v175_v39 = vstv %s448_s6  ;;  %v97_v55 = vmul.f32 %v95_v7, %v77_v41  ;;  %v103_v56 = vmul.f32 %v101_v8, %v81_v42 }
  0x49   :  { %v181_v40 = vstv %s450_s7  ;;  %v116_v43 = vadd.f32 %v114_v21, %v110_v33  ;;  %v166_v45 = vadd.f32 %v164_v35, %v160_v34  ;;  %v176_v46 = vmul.f32 %v175_v39, %v84_v3 }
  0x4a   :  { %v144_v48 = vadd.f32 %v142_v27, %v138_v37  ;;  %v182_v49 = vmul.f32 %v181_v40, %v88_v9  ;;  %v187_v50 = vstv %s453_s8  ;;  %v197_v58 = vstv %s461_s10 }
  0x4b   :  { %v120_v52 = vadd.f32 %v119_v26, %v116_v43  ;;  %v172_v53 = vadd.f32 %v170_v36, %v166_v45  ;;  %v109_v59 = vmul.f32 %v107_v12, %v85_v47  ;;  %v127_v60 = vmul.f32 %v125_v15, %v438_v5 }
  0x4c   :  { %v150_v57 = vadd.f32 %v148_v38, %v144_v48  ;;  %v99_v63 = vadd.f32 %v97_v55, %v93_v16  ;;  %v131_v0 = vmul.f32 %v129_v19, %v77_v41  ;;  %v115_v2 = vmul.f32 %v113_v13, %v89_v54 }
  0x4d   :  { %v122_v61 = vmax.f32 %v120_v52, 0.0  ;;  %v178_v62 = vadd.f32 %v176_v46, %v172_v53  ;;  %v137_v3 = vmul.f32 %v135_v20, %v81_v42  ;;  %v143_v4 = vmul.f32 %v141_v24, %v85_v47 }
  0x4e   :  { %v154_v1 = vadd.f32 %v153_v44, %v150_v57  ;;  %v105_v10 = vadd.f32 %v103_v56, %v99_v63  ;;  %v133_v11 = vadd.f32 %v131_v0, %v127_v60  ;;  %v161_v8 = vmul.f32 %v159_v30, %v438_v5 }
  0x4f   :  { %v184_v6 = vadd.f32 %v182_v49, %v178_v62  ;;  %v194_v9 = vmul.f32 %v193_v51, %v122_v61  ;;  %v165_v14 = vmul.f32 %v163_v31, %v77_v41  ;;  %v171_v12 = vmul.f32 %v169_v32, %v81_v42 }
  0x50   :  { %v156_v7 = vmax.f32 %v154_v1, 0.0  ;;  %v111_v17 = vadd.f32 %v109_v59, %v105_v10  ;;  %v139_v18 = vadd.f32 %v137_v3, %v133_v11  ;;  %v149_v16 = vmul.f32 %v147_v28, %v89_v54 }
  0x51   :  { %v188_v15 = vadd.f32 %v187_v50, %v184_v6  ;;  %v203_v21 = vstv %s473_s11  ;;  %v167_v13 = vadd.f32 %v165_v14, %v161_v8  ;;  %v177_v22 = vmul.f32 %v175_v39, %v85_v47 }
  0x52   :  { %v198_v19 = vmul.f32 %v197_v58, %v156_v7  ;;  %v117_v23 = vadd.f32 %v115_v2, %v111_v17  ;;  %v145_v24 = vadd.f32 %v143_v4, %v139_v18  ;;  %v183_v29 = vmul.f32 %v181_v40, %v89_v54 }
  0x53   :  { %v190_v20 = vmax.f32 %v188_v15, 0.0  ;;  %v173_v27 = vadd.f32 %v171_v12, %v167_v13  ;;  %v209_v31 = vstv %s504_s3  ;;  %s320_s3 = scalar_lea.vmem %s220_s14, 256 }
  0x54   :  { %v200_v25 = vadd.f32 %v198_v19, %v194_v9  ;;  %v121_v5 = vadd.f32 %v119_v26, %v117_v23  ;;  %v151_v30 = vadd.f32 %v149_v16, %v145_v24  ;;  %p321_p9 = scmp.ne.s32.totalorder %s220_s14, %s320_s3  ;;  %p326_p11 = scmp.lt.s32.totalorder %s320_s3, %s320_s3 }
  0x55   :  { %v204_v33 = vmul.f32 %v203_v21, %v190_v20  ;;  %v179_v32 = vadd.f32 %v177_v22, %v173_v27 }
  0x56   :  { %v123_v34 = vmax.f32 %v121_v5, 0.0  ;;  %v155_v35 = vadd.f32 %v153_v44, %v151_v30  ;;  %p327_p12 = por %p326_p11, %p325_p10 }
  0x57   :  { %v206_v28 = vadd.f32 %v204_v33, %v200_v25  ;;  %v185_v36 = vadd.f32 %v183_v29, %v179_v32 }
  0x58   :  { %v157_v38 = vmax.f32 %v155_v35, 0.0  ;;  %v195_v39 = vmul.f32 %v193_v51, %v123_v34  ;;  %p328_p13 = pnand %p327_p12, %p321_p9 }
  0x59   :  { %v210_v37 = vadd.f32 %v209_v31, %v206_v28  ;;  %v189_v41 = vadd.f32 %v187_v50, %v185_v36 }
  0x5a   :  { %v199_v42 = vmul.f32 %v197_v58, %v157_v38 }
  0x5b   :  { %212 = vst [vmem:[#allocation11] sm:$0xff] %v210_v37  ;;  %v191_v40 = vmax.f32 %v189_v41, 0.0 }
  0x5c   :  { %v201_v43 = vadd.f32 %v199_v42, %v195_v39 }
  0x5d   :  { %v205_v45 = vmul.f32 %v203_v21, %v191_v40 }
  0x5f   :  { %v207_v26 = vadd.f32 %v205_v45, %v201_v43 }
  0x61   :  { %v211_v46 = vadd.f32 %v209_v31, %v207_v26 }
  0x63   :  { %213 = vst [vmem:[#allocation11 + $0x8] sm:$0xff] %v211_v46 }
  0x64   :  { %331 = shalt.err (!%p328_p13)
}
  0x65   :  { %s332_s19 = scalar_lea.hbm %s506_s5, 256 }
  0x66   :  { %p333_p0 = scmp.ne.s32.totalorder %s506_s5, %s332_s19  ;;  %p336_p1 = scmp.lt.u32.totalorder %s332_s19, %s506_s5 }
  0x68   :  { %p338_p2 = pnand %p336_p1, %p333_p0 }
  0x6a   :  { %341 = shalt.err (!%p338_p2)
}
  0x6b   :  { %225 = dma.vmem_to_hbm [thread:$0]  %s220_s14, 256, %s506_s5, [#allocation5], %s354_s15, %s354_s15, %s355_s16  }
  0x6c   :  { %348 = dma.done.wait [#allocation5], 256  }
  0x6d   :  { %349 = vsyncadd [#allocation5], 4294967040 }
  0x6e   :  { %229 = vsyncpa [#allocation4], 1 }
  0x6f   :  { %230 = vsyncpa [#allocation5], 1 }
  0x70   :  { %231 = vsyncpa [#allocation6], 1 }
  0x71   :  { %232 = vsyncpa [#allocation8], 1 }

</bundles_post_ra>
